<compile_context>
chip_gen: v7x
topology: tpu7x:2x2x1
jax: 0.10.0
libtpu: 0.0.40
codegen_flags: <defaults>
</compile_context>

<pallas_src>
import functools

import jax
import jax.numpy as jnp
from jax.experimental import pallas as pl
from jax.experimental.pallas import tpu as pltpu


def _fusion_kernel(*refs, eps, slope, num_feats, layer_scales, s_valid, s_pad):
    """One batch element per grid step.

    refs (in order):
      x_0..x_{L-1}   : [C_i, S_pad]   input features (batch dim squeezed)
      wp_0..wp_{L-1} : [C_out, C_i]   1x1x1 projection weights (bias cancels)
      wb             : [C_out, C_out] blend conv weight
      bb             : [C_out, 1]     blend conv bias
      out            : [C_out, S_pad]
    """
    x_refs = refs[:num_feats]
    wp_refs = refs[num_feats:2 * num_feats]
    wb_ref = refs[2 * num_feats]
    bb_ref = refs[2 * num_feats + 1]
    out_ref = refs[2 * num_feats + 2]

    n_pad = s_pad - s_valid
    inv_s = 1.0 / float(s_valid)

    acc = None
    for i in range(num_feats):
        # 1x1x1 Conv3d (no bias: it is removed exactly by InstanceNorm).
        proj = jnp.dot(wp_refs[i][...], x_refs[i][...],
                       preferred_element_type=jnp.float32)          # [C_out, S_pad]

        # InstanceNorm3d stats over the valid spatial positions only.
        # Padded columns of x are zero -> proj is zero there, so the row sum
        # over the padded block equals the sum over the valid columns.
        mean = jnp.sum(proj, axis=-1, keepdims=True) * inv_s        # [C_out, 1]
        centered = proj - mean
        # Two-pass variance; padded columns of `centered` equal -mean, so
        # remove their contribution analytically.
        sumsq = jnp.sum(centered * centered, axis=-1, keepdims=True)
        if n_pad:
            sumsq = sumsq - float(n_pad) * (mean * mean)
        var = sumsq * inv_s
        inv_std = jax.lax.rsqrt(var + eps)                          # [C_out, 1]

        # LeakyReLU(0.2) on the *centered* values; since inv_std > 0,
        # leaky_relu(inv_std * c) == inv_std * leaky_relu(c), so inv_std (and
        # the static progressive layer scale) are folded into the blend
        # weight's columns instead of scaling the [C_out, S] tensor.
        act = jnp.maximum(centered, slope * centered)
        col_scale = (layer_scales[i] * inv_std).reshape(1, -1)      # [1, C_out]
        wb_i = wb_ref[...] * col_scale                              # [C_out, C_out]
        contrib = jnp.dot(wb_i, act, preferred_element_type=jnp.float32)
        acc = contrib if acc is None else acc + contrib

    out_ref[...] = (acc + bb_ref[...]).astype(out_ref.dtype)


def fusion_block_pallas(features, proj_ws, proj_bs, blend_w, blend_b,
                        eps=1e-5, slope=0.2):
    """
    features: list of [N, C_i, D, H, W] float32 arrays (all same spatial size).
    proj_ws:  list of [C_out, C_i] 1x1x1 conv weights.
    proj_bs:  list of [C_out] conv biases (unused: cancelled by InstanceNorm).
    blend_w:  [C_out, C_out] blend conv weight.
    blend_b:  [C_out] blend conv bias.
    Returns [N, C_out, D, H, W].
    """
    del proj_bs  # Exactly cancelled by InstanceNorm(affine=False).

    num_feats = len(features)
    N = features[0].shape[0]
    D, H, W = features[-1].shape[2:]
    S = D * H * W
    c_out = blend_w.shape[0]

    # TODO(synk): trilinear align_corners resize for mismatched spatial sizes.
    for f in features:
        assert f.shape[2:] == (D, H, W), "resize branch not implemented"

    denom = max(1, num_feats - 1)
    layer_weights = [0.5 + i / denom * 1.0 for i in range(num_feats)]
    total_weight = float(sum(layer_weights))
    layer_scales = tuple(float(lw / total_weight) for lw in layer_weights)

    # Pad the spatial (lane) axis to a multiple of 128 -> unmasked stores.
    S_pad = ((S + 127) // 128) * 128
    xs = []
    for f in features:
        x = f.reshape(N, f.shape[1], S).astype(jnp.float32)
        if S_pad != S:
            x = jnp.pad(x, ((0, 0), (0, 0), (0, S_pad - S)))
        xs.append(x)
    sum_c = sum(x.shape[1] for x in xs)

    wps = [w.astype(jnp.float32) for w in proj_ws]
    wb = blend_w.astype(jnp.float32)
    bb = blend_b.reshape(c_out, 1).astype(jnp.float32)

    kernel = functools.partial(
        _fusion_kernel, eps=float(eps), slope=float(slope),
        num_feats=num_feats, layer_scales=layer_scales,
        s_valid=S, s_pad=S_pad)

    in_specs = (
        [pl.BlockSpec((pl.Squeezed(), x.shape[1], S_pad), lambda n: (n, 0, 0))
         for x in xs]
        + [pl.BlockSpec(w.shape, lambda n: (0, 0)) for w in wps]
        + [pl.BlockSpec(wb.shape, lambda n: (0, 0)),
           pl.BlockSpec(bb.shape, lambda n: (0, 0))]
    )
    out_spec = pl.BlockSpec((pl.Squeezed(), c_out, S_pad), lambda n: (n, 0, 0))

    # Per-grid-step VMEM footprint estimate (double-buffered x/out + f32 temps)
    # -> raise the scoped-VMEM limit so the single-pass path stays compilable.
    vmem_est = 4 * S_pad * (2 * sum_c + 8 * c_out) + (1 << 20)
    vmem_limit = int(min(100 * 1024 * 1024,
                         max(32 * 1024 * 1024, 2 * vmem_est)))

    out_ncs = pl.pallas_call(
        kernel,
        out_shape=jax.ShapeDtypeStruct((N, c_out, S_pad), jnp.float32),
        grid_spec=pltpu.PrefetchScalarGridSpec(
            num_scalar_prefetch=0,
            grid=(N,),
            in_specs=in_specs,
            out_specs=out_spec,
        ),
        compiler_params=pltpu.CompilerParams(
            dimension_semantics=("parallel",),
            vmem_limit_bytes=vmem_limit),
    )(*xs, *wps, wb, bb)

    return out_ncs[:, :, :S].reshape(N, c_out, D, H, W)


def fusion_block_reference(features, proj_ws, proj_bs, blend_w, blend_b,
                           eps=1e-5, slope=0.2):
    """Plain-JAX reference matching the PyTorch FusionBlock forward (NCDHW)."""
    num_feats = len(features)
    denom = max(1, num_feats - 1)
    N = features[0].shape[0]
    D, H, W = features[-1].shape[2:]
    c_out = blend_w.shape[0]

    fused = None
    total = 0.0
    for i, f in enumerate(features):
        x = f.reshape(N, f.shape[1], -1)                                # [N,C,S]
        proj = jnp.einsum("oc,ncs->nos", proj_ws[i], x) + proj_bs[i][None, :, None]
        mean = jnp.mean(proj, axis=-1, keepdims=True)
        var = jnp.mean((proj - mean) ** 2, axis=-1, keepdims=True)
        normed = (proj - mean) / jnp.sqrt(var + eps)
        act = jnp.where(normed >= 0, normed, slope * normed)
        lw = 0.5 + i / denom * 1.0
        total += lw
        contrib = act * lw
        fused = contrib if fused is None else fused + contrib
    fused = fused / total
    out = jnp.einsum("oc,ncs->nos", blend_w, fused) + blend_b[None, :, None]
    return out.reshape(N, c_out, D, H, W)


def _run_case(channels_list, N, D, H, W, seed):
    c_out = max(channels_list)
    key = jax.random.PRNGKey(seed)
    keys = jax.random.split(key, 3 * len(channels_list) + 2)
    ki = iter(keys)

    features = [
        jax.random.normal(next(ki), (N, c, D, H, W), dtype=jnp.float32)
        for c in channels_list
    ]
    proj_ws, proj_bs = [], []
    for c in channels_list:
        w = jax.random.normal(next(ki), (c_out, c), dtype=jnp.float32) * (1.0 / c ** 0.5)
        b = jax.random.normal(next(ki), (c_out,), dtype=jnp.float32) * 0.1
        proj_ws.append(w)
        proj_bs.append(b)
    blend_w = jax.random.normal(next(ki), (c_out, c_out), dtype=jnp.float32) * (1.0 / c_out ** 0.5)
    blend_b = jax.random.normal(next(ki), (c_out,), dtype=jnp.float32) * 0.1

    out = fusion_block_pallas(features, proj_ws, proj_bs, blend_w, blend_b)
    out = jax.block_until_ready(out)
    ref = fusion_block_reference(features, proj_ws, proj_bs, blend_w, blend_b)
    ref = jax.block_until_ready(ref)

    assert out.shape == (N, c_out, D, H, W), out.shape
    max_err = float(jnp.max(jnp.abs(out - ref)))
    assert jnp.allclose(out, ref, atol=2e-4, rtol=2e-4), max_err
    return max_err


if __name__ == "__main__":
    # Case 1: S = 4*8*8 = 256 (lane-aligned fast path).
    _run_case([4, 6, 8], N=2, D=4, H=8, W=8, seed=0)
    # Case 2: S = 3*5*7 = 105 (exercises lane padding + masked statistics).
    _run_case([4, 6, 8], N=2, D=3, H=5, W=7, seed=1)
    print("KERNEL_OK")
</pallas_src>

<mosaic_0001>
module attributes {stable_mosaic.version = 11 : i64} {
  func.func @_fusion_kernel(%arg0: i32, %arg1: memref<1x4x256xf32, #tpu.memory_space<vmem>>, %arg2: memref<1x6x256xf32, #tpu.memory_space<vmem>>, %arg3: memref<1x8x256xf32, #tpu.memory_space<vmem>>, %arg4: memref<8x4xf32, #tpu.memory_space<vmem>>, %arg5: memref<8x6xf32, #tpu.memory_space<vmem>>, %arg6: memref<8x8xf32, #tpu.memory_space<vmem>>, %arg7: memref<8x8xf32, #tpu.memory_space<vmem>>, %arg8: memref<8x1xf32, #tpu.memory_space<vmem>>, %arg9: memref<1x8x256xf32, #tpu.memory_space<vmem>>) attributes {dimension_semantics = [#tpu.dimension_semantics<parallel>], iteration_bounds = array<i64: 2>, scalar_prefetch = 0 : i64, scratch_operands = 0 : i64, tpu.core_type = #tpu.core_type<tc>, window_params = [{transform_indices = @transform_0, window_bounds = array<i64: 1, 4, 256>}, {transform_indices = @transform_1, window_bounds = array<i64: 1, 6, 256>}, {transform_indices = @transform_2, window_bounds = array<i64: 1, 8, 256>}, {pipeline_mode = #tpu.pipeline_mode<synchronous>, transform_indices = @transform_3, window_bounds = array<i64: 8, 4>}, {pipeline_mode = #tpu.pipeline_mode<synchronous>, transform_indices = @transform_4, window_bounds = array<i64: 8, 6>}, {pipeline_mode = #tpu.pipeline_mode<synchronous>, transform_indices = @transform_5, window_bounds = array<i64: 8, 8>}, {pipeline_mode = #tpu.pipeline_mode<synchronous>, transform_indices = @transform_6, window_bounds = array<i64: 8, 8>}, {pipeline_mode = #tpu.pipeline_mode<synchronous>, transform_indices = @transform_7, window_bounds = array<i64: 8, 1>}, {transform_indices = @transform_8, window_bounds = array<i64: 1, 8, 256>}]} {
    %c0 = arith.constant 0 : index
    %c0_0 = arith.constant 0 : index
    %0 = vector.load %arg4[%c0, %c0_0] : memref<8x4xf32, #tpu.memory_space<vmem>>, vector<8x4xf32>
    %c0_1 = arith.constant 0 : index
    %c0_2 = arith.constant 0 : index
    %c0_3 = arith.constant 0 : index
    %1 = vector.load %arg1[%c0_1, %c0_2, %c0_3] : memref<1x4x256xf32, #tpu.memory_space<vmem>>, vector<1x4x256xf32>
    %2 = vector.shape_cast %1 : vector<1x4x256xf32> to vector<4x256xf32>
    %cst = arith.constant dense<0.000000e+00> : vector<8x256xf32>
    %3 = tpu.matmul %0, %2, %cst {dimension_numbers = #tpu.dot_dimension_numbers<[1], [0], [0], [1], [0, 0, 1, 1], [], []>} : vector<8x4xf32>, vector<4x256xf32>, vector<8x256xf32> -> vector<8x256xf32>
    %cst_4 = arith.constant dense<0.000000e+00> : vector<8xf32>
    %4 = vector.multi_reduction <add>, %3, %cst_4 [1] : vector<8x256xf32> to vector<8xf32>
    %5 = vector.shape_cast %4 : vector<8xf32> to vector<8x1xf32>
    %cst_5 = arith.constant 3.906250e-03 : f32
    %6 = vector.broadcast %cst_5 : f32 to vector<8x1xf32>
    %7 = arith.mulf %5, %6 : vector<8x1xf32>
    %8 = vector.broadcast %7 : vector<8x1xf32> to vector<8x256xf32>
    %9 = arith.subf %3, %8 : vector<8x256xf32>
    %10 = arith.mulf %9, %9 : vector<8x256xf32>
    %cst_6 = arith.constant dense<0.000000e+00> : vector<8xf32>
    %11 = vector.multi_reduction <add>, %10, %cst_6 [1] : vector<8x256xf32> to vector<8xf32>
    %12 = vector.shape_cast %11 : vector<8xf32> to vector<8x1xf32>
    %cst_7 = arith.constant 3.906250e-03 : f32
    %13 = vector.broadcast %cst_7 : f32 to vector<8x1xf32>
    %14 = arith.mulf %12, %13 : vector<8x1xf32>
    %cst_8 = arith.constant 9.99999974E-6 : f32
    %15 = vector.broadcast %cst_8 : f32 to vector<8x1xf32>
    %16 = arith.addf %14, %15 : vector<8x1xf32>
    %17 = math.rsqrt %16 : vector<8x1xf32>
    %cst_9 = arith.constant 2.000000e-01 : f32
    %18 = vector.broadcast %cst_9 : f32 to vector<8x256xf32>
    %19 = arith.mulf %18, %9 : vector<8x256xf32>
    %20 = arith.maximumf %9, %19 : vector<8x256xf32>
    %cst_10 = arith.constant 0.166666672 : f32
    %21 = vector.broadcast %cst_10 : f32 to vector<8x1xf32>
    %22 = arith.mulf %21, %17 : vector<8x1xf32>
    %23 = vector.shape_cast %22 : vector<8x1xf32> to vector<1x8xf32>
    %c0_11 = arith.constant 0 : index
    %c0_12 = arith.constant 0 : index
    %24 = vector.load %arg7[%c0_11, %c0_12] : memref<8x8xf32, #tpu.memory_space<vmem>>, vector<8x8xf32>
    %25 = vector.broadcast %23 : vector<1x8xf32> to vector<8x8xf32>
    %26 = arith.mulf %24, %25 : vector<8x8xf32>
    %cst_13 = arith.constant dense<0.000000e+00> : vector<8x256xf32>
    %27 = tpu.matmul %26, %20, %cst_13 {dimension_numbers = #tpu.dot_dimension_numbers<[1], [0], [0], [1], [0, 0, 1, 1], [], []>} : vector<8x8xf32>, vector<8x256xf32>, vector<8x256xf32> -> vector<8x256xf32>
    %c0_14 = arith.constant 0 : index
    %c0_15 = arith.constant 0 : index
    %28 = vector.load %arg5[%c0_14, %c0_15] : memref<8x6xf32, #tpu.memory_space<vmem>>, vector<8x6xf32>
    %c0_16 = arith.constant 0 : index
    %c0_17 = arith.constant 0 : index
    %c0_18 = arith.constant 0 : index
    %29 = vector.load %arg2[%c0_16, %c0_17, %c0_18] : memref<1x6x256xf32, #tpu.memory_space<vmem>>, vector<1x6x256xf32>
    %30 = vector.shape_cast %29 : vector<1x6x256xf32> to vector<6x256xf32>
    %cst_19 = arith.constant dense<0.000000e+00> : vector<8x256xf32>
    %31 = tpu.matmul %28, %30, %cst_19 {dimension_numbers = #tpu.dot_dimension_numbers<[1], [0], [0], [1], [0, 0, 1, 1], [], []>} : vector<8x6xf32>, vector<6x256xf32>, vector<8x256xf32> -> vector<8x256xf32>
    %cst_20 = arith.constant dense<0.000000e+00> : vector<8xf32>
    %32 = vector.multi_reduction <add>, %31, %cst_20 [1] : vector<8x256xf32> to vector<8xf32>
    %33 = vector.shape_cast %32 : vector<8xf32> to vector<8x1xf32>
    %cst_21 = arith.constant 3.906250e-03 : f32
    %34 = vector.broadcast %cst_21 : f32 to vector<8x1xf32>
    %35 = arith.mulf %33, %34 : vector<8x1xf32>
    %36 = vector.broadcast %35 : vector<8x1xf32> to vector<8x256xf32>
    %37 = arith.subf %31, %36 : vector<8x256xf32>
    %38 = arith.mulf %37, %37 : vector<8x256xf32>
    %cst_22 = arith.constant dense<0.000000e+00> : vector<8xf32>
    %39 = vector.multi_reduction <add>, %38, %cst_22 [1] : vector<8x256xf32> to vector<8xf32>
    %40 = vector.shape_cast %39 : vector<8xf32> to vector<8x1xf32>
    %cst_23 = arith.constant 3.906250e-03 : f32
    %41 = vector.broadcast %cst_23 : f32 to vector<8x1xf32>
    %42 = arith.mulf %40, %41 : vector<8x1xf32>
    %cst_24 = arith.constant 9.99999974E-6 : f32
    %43 = vector.broadcast %cst_24 : f32 to vector<8x1xf32>
    %44 = arith.addf %42, %43 : vector<8x1xf32>
    %45 = math.rsqrt %44 : vector<8x1xf32>
    %cst_25 = arith.constant 2.000000e-01 : f32
    %46 = vector.broadcast %cst_25 : f32 to vector<8x256xf32>
    %47 = arith.mulf %46, %37 : vector<8x256xf32>
    %48 = arith.maximumf %37, %47 : vector<8x256xf32>
    %cst_26 = arith.constant 0.333333343 : f32
    %49 = vector.broadcast %cst_26 : f32 to vector<8x1xf32>
    %50 = arith.mulf %49, %45 : vector<8x1xf32>
    %51 = vector.shape_cast %50 : vector<8x1xf32> to vector<1x8xf32>
    %c0_27 = arith.constant 0 : index
    %c0_28 = arith.constant 0 : index
    %52 = vector.load %arg7[%c0_27, %c0_28] : memref<8x8xf32, #tpu.memory_space<vmem>>, vector<8x8xf32>
    %53 = vector.broadcast %51 : vector<1x8xf32> to vector<8x8xf32>
    %54 = arith.mulf %52, %53 : vector<8x8xf32>
    %cst_29 = arith.constant dense<0.000000e+00> : vector<8x256xf32>
    %55 = tpu.matmul %54, %48, %cst_29 {dimension_numbers = #tpu.dot_dimension_numbers<[1], [0], [0], [1], [0, 0, 1, 1], [], []>} : vector<8x8xf32>, vector<8x256xf32>, vector<8x256xf32> -> vector<8x256xf32>
    %56 = arith.addf %27, %55 : vector<8x256xf32>
    %c0_30 = arith.constant 0 : index
    %c0_31 = arith.constant 0 : index
    %57 = vector.load %arg6[%c0_30, %c0_31] : memref<8x8xf32, #tpu.memory_space<vmem>>, vector<8x8xf32>
    %c0_32 = arith.constant 0 : index
    %c0_33 = arith.constant 0 : index
    %c0_34 = arith.constant 0 : index
    %58 = vector.load %arg3[%c0_32, %c0_33, %c0_34] : memref<1x8x256xf32, #tpu.memory_space<vmem>>, vector<1x8x256xf32>
    %59 = vector.shape_cast %58 : vector<1x8x256xf32> to vector<8x256xf32>
    %cst_35 = arith.constant dense<0.000000e+00> : vector<8x256xf32>
    %60 = tpu.matmul %57, %59, %cst_35 {dimension_numbers = #tpu.dot_dimension_numbers<[1], [0], [0], [1], [0, 0, 1, 1], [], []>} : vector<8x8xf32>, vector<8x256xf32>, vector<8x256xf32> -> vector<8x256xf32>
    %cst_36 = arith.constant dense<0.000000e+00> : vector<8xf32>
    %61 = vector.multi_reduction <add>, %60, %cst_36 [1] : vector<8x256xf32> to vector<8xf32>
    %62 = vector.shape_cast %61 : vector<8xf32> to vector<8x1xf32>
    %cst_37 = arith.constant 3.906250e-03 : f32
    %63 = vector.broadcast %cst_37 : f32 to vector<8x1xf32>
    %64 = arith.mulf %62, %63 : vector<8x1xf32>
    %65 = vector.broadcast %64 : vector<8x1xf32> to vector<8x256xf32>
    %66 = arith.subf %60, %65 : vector<8x256xf32>
    %67 = arith.mulf %66, %66 : vector<8x256xf32>
    %cst_38 = arith.constant dense<0.000000e+00> : vector<8xf32>
    %68 = vector.multi_reduction <add>, %67, %cst_38 [1] : vector<8x256xf32> to vector<8xf32>
    %69 = vector.shape_cast %68 : vector<8xf32> to vector<8x1xf32>
    %cst_39 = arith.constant 3.906250e-03 : f32
    %70 = vector.broadcast %cst_39 : f32 to vector<8x1xf32>
    %71 = arith.mulf %69, %70 : vector<8x1xf32>
    %cst_40 = arith.constant 9.99999974E-6 : f32
    %72 = vector.broadcast %cst_40 : f32 to vector<8x1xf32>
    %73 = arith.addf %71, %72 : vector<8x1xf32>
    %74 = math.rsqrt %73 : vector<8x1xf32>
    %cst_41 = arith.constant 2.000000e-01 : f32
    %75 = vector.broadcast %cst_41 : f32 to vector<8x256xf32>
    %76 = arith.mulf %75, %66 : vector<8x256xf32>
    %77 = arith.maximumf %66, %76 : vector<8x256xf32>
    %cst_42 = arith.constant 5.000000e-01 : f32
    %78 = vector.broadcast %cst_42 : f32 to vector<8x1xf32>
    %79 = arith.mulf %78, %74 : vector<8x1xf32>
    %80 = vector.shape_cast %79 : vector<8x1xf32> to vector<1x8xf32>
    %c0_43 = arith.constant 0 : index
    %c0_44 = arith.constant 0 : index
    %81 = vector.load %arg7[%c0_43, %c0_44] : memref<8x8xf32, #tpu.memory_space<vmem>>, vector<8x8xf32>
    %82 = vector.broadcast %80 : vector<1x8xf32> to vector<8x8xf32>
    %83 = arith.mulf %81, %82 : vector<8x8xf32>
    %cst_45 = arith.constant dense<0.000000e+00> : vector<8x256xf32>
    %84 = tpu.matmul %83, %77, %cst_45 {dimension_numbers = #tpu.dot_dimension_numbers<[1], [0], [0], [1], [0, 0, 1, 1], [], []>} : vector<8x8xf32>, vector<8x256xf32>, vector<8x256xf32> -> vector<8x256xf32>
    %85 = arith.addf %56, %84 : vector<8x256xf32>
    %c0_46 = arith.constant 0 : index
    %c0_47 = arith.constant 0 : index
    %86 = vector.load %arg8[%c0_46, %c0_47] : memref<8x1xf32, #tpu.memory_space<vmem>>, vector<8x1xf32>
    %87 = vector.broadcast %86 : vector<8x1xf32> to vector<8x256xf32>
    %88 = arith.addf %85, %87 : vector<8x256xf32>
    %c0_48 = arith.constant 0 : index
    %c0_49 = arith.constant 0 : index
    %c0_50 = arith.constant 0 : index
    %89 = vector.load %arg9[%c0_48, %c0_49, %c0_50] : memref<1x8x256xf32, #tpu.memory_space<vmem>>, vector<1x8x256xf32>
    %90 = vector.shape_cast %89 : vector<1x8x256xf32> to vector<8x256xf32>
    %91 = vector.shape_cast %88 : vector<8x256xf32> to vector<1x8x256xf32>
    tpu.vector_store %arg9[%c0_48, %c0_49, %c0_50], %91 {strides = array<i32>} : memref<1x8x256xf32, #tpu.memory_space<vmem>>, vector<1x8x256xf32>,
    return
  }
  func.func @transform_0(%arg0: i32) -> (i32, i32, i32) {
    %c0_i32 = arith.constant 0 : i32
    %c0_i32_0 = arith.constant 0 : i32
    %c0_i32_1 = arith.constant 0 : i32
    return %arg0, %c0_i32, %c0_i32_0 : i32, i32, i32
  }
  func.func @transform_1(%arg0: i32) -> (i32, i32, i32) {
    %c0_i32 = arith.constant 0 : i32
    %c0_i32_0 = arith.constant 0 : i32
    %c0_i32_1 = arith.constant 0 : i32
    return %arg0, %c0_i32, %c0_i32_0 : i32, i32, i32
  }
  func.func @transform_2(%arg0: i32) -> (i32, i32, i32) {
    %c0_i32 = arith.constant 0 : i32
    %c0_i32_0 = arith.constant 0 : i32
    %c0_i32_1 = arith.constant 0 : i32
    return %arg0, %c0_i32, %c0_i32_0 : i32, i32, i32
  }
  func.func @transform_3(%arg0: i32) -> (i32, i32) {
    %c0_i32 = arith.constant 0 : i32
    %c0_i32_0 = arith.constant 0 : i32
    %c0_i32_1 = arith.constant 0 : i32
    return %c0_i32, %c0_i32_0 : i32, i32
  }
  func.func @transform_4(%arg0: i32) -> (i32, i32) {
    %c0_i32 = arith.constant 0 : i32
    %c0_i32_0 = arith.constant 0 : i32
    %c0_i32_1 = arith.constant 0 : i32
    return %c0_i32, %c0_i32_0 : i32, i32
  }
  func.func @transform_5(%arg0: i32) -> (i32, i32) {
    %c0_i32 = arith.constant 0 : i32
    %c0_i32_0 = arith.constant 0 : i32
    %c0_i32_1 = arith.constant 0 : i32
    return %c0_i32, %c0_i32_0 : i32, i32
  }
  func.func @transform_6(%arg0: i32) -> (i32, i32) {
    %c0_i32 = arith.constant 0 : i32
    %c0_i32_0 = arith.constant 0 : i32
    %c0_i32_1 = arith.constant 0 : i32
    return %c0_i32, %c0_i32_0 : i32, i32
  }
  func.func @transform_7(%arg0: i32) -> (i32, i32) {
    %c0_i32 = arith.constant 0 : i32
    %c0_i32_0 = arith.constant 0 : i32
    %c0_i32_1 = arith.constant 0 : i32
    return %c0_i32, %c0_i32_0 : i32, i32
  }
  func.func @transform_8(%arg0: i32) -> (i32, i32, i32) {
    %c0_i32 = arith.constant 0 : i32
    %c0_i32_0 = arith.constant 0 : i32
    %c0_i32_1 = arith.constant 0 : i32
    return %arg0, %c0_i32, %c0_i32_0 : i32, i32, i32
  }
}

</mosaic_0001>

<bundles_post_ra>
// kernel: tpu_custom_call.1
= control target key start
LH: loop header
LB: loop body
LE: loop exit
PB: predicated region body
PF: predicated region fallthrough
CT: control target
= control target key end

     0   :  { %13 = vsyncpa [#allocation3], 0  ;;  %s1360_s0 = inlined_call_operand.vmem [shape: f32[2,4,256], index: 0, kind: input, shape index: {}]   ;;  %s1361_s1 = inlined_call_operand.vmem [shape: f32[2,6,256], index: 1, kind: input, shape index: {}]   ;;  %s1362_s2 = inlined_call_operand.vmem [shape: f32[2,8,256], index: 2, kind: input, shape index: {}]   ;;  %s1363_s3 = inlined_call_operand.vmem [shape: f32[8,4], index: 3, kind: input, shape index: {}]   ;;  %s1364_s4 = inlined_call_operand.vmem [shape: f32[8,6], index: 4, kind: input, shape index: {}]   ;;  %s1365_s5 = inlined_call_operand.vmem [shape: f32[8,8], index: 5, kind: input, shape index: {}]   ;;  %s1366_s6 = inlined_call_operand.vmem [shape: f32[8,8], index: 6, kind: input, shape index: {}]   ;;  %s1367_s7 = inlined_call_operand.vmem [shape: f32[8,1], index: 7, kind: input, shape index: {}]   ;;  %s1368_s8 = inlined_call_operand.hbm [shape: f32[2,8,256], index: 8, kind: output, shape index: {}]  }
   0x1   :  { %15 = vsyncpa [#allocation3 + $0x1], 0  ;;  %s1223_s27 = smov 0   ;;  %s1225_s28 = smov 0  }
   0x2   :  { %s1227_s29 = smov 0   ;;  %s1229_s30 = smov 0  }
   0x3 LB: > { %s1244_s9 = sadd.s32 4294967295, %s1173_s30   ;;  %s1028_s10 = sadd.s32 4294967294, %s1173_s30   ;;  %s1173_s30 = sphi %s1229_s30, %s1376_s30   ;;  %s1169_s29 = sphi %s1227_s29, %s1375_s29   ;;  %s1165_s28 = sphi %s1225_s28, %s1374_s28   ;;  %s1161_s27 = sphi %s1223_s27, %s1373_s27  }
   0x4   : > { %s1248_s11 = sadd.s32 1, %s1173_s30   ;;  %s211_s12 = sadd.s32 1, %s1169_s29 }
   0x5   : > { %s208_s13 = ssub.s32 %s1173_s30, %s1248_s11  ;;  %p221_p0 = scmp.ne.s32.totalorder %s1169_s29, %s1165_s28 }
   0x6   : > { %p209_p1 = scmp.eq.s32.totalorder %s208_s13, 0  ;;  %p222_p2 = scmp.eq.s32.totalorder %s1244_s9, 1 }
   0x7   : > { %p227_p3 = scmp.ne.s32.totalorder %s1165_s28, %s1161_s27  ;;  %p228_p4 = scmp.eq.s32.totalorder %s1028_s10, 1 }
   0x8   : > { %s1259_s14 = scalar_select %p209_p1, %s1169_s29, %s211_s12  }
   0x9   : > { %p1261_p5 = por %p222_p2, %p221_p0  ;;  %p1265_p6 = por %p228_p4, %p227_p3 }
   0xa   : > { %1369 = sst [smem:[#allocation5_spill]] %s1259_s14  ;;  %p1031_p7 = scmp.ge.s32.totalorder %s1173_s30, 1 }
   0xb   : > { %p285_p8 = scmp.lt.s32.totalorder %s1173_s30, 3 }
   0xd   : > { %p286_p9 = pnand %p1031_p7, %p285_p8 }
   0xe   : > { %p329_p10 = scmp.lt.s32.totalorder (!%p286_p9), %s1244_s9, 1  ;;  %v1175_v0 = vmov (!%p286_p9), 0.0   ;;  %vm352_vm0 = vcmask (!%p286_p9), 1043456   ;;  %v344_v3 = vld [vmem:[%s1363_s3] sm:$0xff] (!%p286_p9)  ;;  %vm348_vm1 = vcmask (!%p286_p9), 31744   ;;  %vm476_vm2 = vcmask (!%p286_p9), 1045504  }
   0xf   : > { %289 = sbr.rel (%p286_p9) target bundleno = 809 (0x329), region = 52  ;;  %421 = vmatprep.mubr.f32.mxu1 (!%p286_p9), %v1175_v0  ;;  %654 = vmatprep.mubr.f32.mxu0 (!%p286_p9), %v1175_v0  ;;  %v469_v7 = vld [vmem:[%s1364_s4] sm:$0xff] (!%p286_p9)  ;;  %vm472_vm3 = vcmask (!%p286_p9), 48128   ;;  %vm586_vm4 = vcmask (!%p286_p9), 64512   ;;  %v1176_v47 = vmov (!%p286_p9), 0   ;;  %v449_v53 = vlaneseq (!%p286_p9)  ;;  %s326_s24 = sand.u32 (!%p286_p9), 1, %s1165_s28  }
  0x10   : > { %v735_v9 = vld [vmem:[%s1365_s5] sm:$0xff] (!%p286_p9)  ;;  %1103 = vset.pattern.permute.xlu0 (!%p286_p9), %v1176_v47  ;;  %s1057_s26 = sshll.u32 (!%p286_p9), %s1244_s9, 8  ;;  %s931_s14 = scalar_lea.sflag (!%p286_p9), [#allocation3], %s326_s24 }
  0x11   : > { %v920_v46 = vld [vmem:[%s1367_s7] sm:$0xff] (!%p286_p9)  ;;  %v450_v57 = vand.u32 (!%p286_p9), 127, %v449_v53  ;;  %v452_v58 = vshrl.u32 (!%p286_p9), %v449_v53, 7 }
  0x13   : > { %v453_v60 = vsub.s32 (!%p286_p9), %v450_v57, %v452_v58 }
  0x16   : > { %s330_s17 = scalar_select %p329_p10, %s1244_s9, 1 }
  0x18   : > { %s1054_s18 = sshll.u32 %s330_s17, 3  ;;  %s1055_s19 = sshll.u32 %s330_s17, 4 }
  0x19   : > { %s333_s22 = scalar_lea.vmem %s1360_s0, %s1054_s18  ;;  %s338_s25 = scalar_lea.vmem %s1361_s1, %s1055_s19 }
  0x1a   : > { %v345_v1 = vld [vmem:[%s333_s22] sm:$0xff]  ;;  %s343_s12 = scalar_lea.vmem %s1362_s2, %s1055_s19  ;;  %v471_v4 = vld [vmem:[%s338_s25 + $0x8] sm:$0x3f]  ;;  %s1318_s18 = scalar_lea.hbm %s1368_s8, %s1057_s26 }
  0x1b   : > { %v347_v2 = vcombine.high %v345_v1, %v345_v1  ;;  %v470_v5 = vld [vmem:[%s338_s25] sm:$0x3f]  ;;  %v737_v6 = vld [vmem:[%s343_s12 + $0x8] sm:$0xff]  ;;  %s1032_s25 = sshll.u32 %s326_s24, 4  ;;  %s1177_s19 = smov [#allocation2]  }
  0x1c   : > { %v736_v8 = vld [vmem:[%s343_s12] sm:$0xff]  ;;  %s328_s10 = scalar_lea.vmem [#allocation2], %s1032_s25  ;;  %s1115_s20 = sshll.u32 %s1177_s19, 4  ;;  %s1116_s20 = int_to_ptr.vmem [resolvable:$false] %s1115_s20 }
  0x1d   : > { %1039 = vmatprep.subr.msk.mxu1 %vm352_vm0, %v347_v2  ;;  %s945_s12 = sshll.u32 %s328_s10, 4  ;;  %s1117_s21 = scalar_lea.vmem %s1116_s20, 512  ;;  %s1320_s12 = int_to_ptr.vmem [resolvable:$true] %s945_s12 }
  0x1e   : > { %1040 = vmatpush1.msk.msra.mxu1 %vm352_vm0, %v345_v1  ;;  %v447_v1 = vld [vmem:[%s1366_s6] sm:$0xff]  ;;  %s1111_s9 = scalar_lea.vmem %s1320_s12, 256  ;;  %p1118_p0 = scmp.lt.s32.totalorder %s1320_s12, %s1116_s20 }
  0x1f   : > { %1041 = vmatmul.mubr.msk.f32.vlgmr.msra.gmra.mrb[0].mxu1 %vm348_vm1, %v344_v3  ;;  %1042 = vmatprep.subr.msk.mxu1 %vm476_vm2, %v471_v4  ;;  %p1112_p11 = scmp.ne.s32.totalorder %s1320_s12, %s1111_s9  ;;  %p1119_p1 = scmp.lt.s32.totalorder %s1117_s21, %s1111_s9 }
  0x20   : > { %1043 = vmatpush1.msk.msra.mxu1 %vm476_vm2, %v470_v5  ;;  %547 = vmatprep.mubr.f32.mxu1 %v1175_v0 }
  0x21   : > { %741 = vmatprep.subr.mxu1 %v737_v6  ;;  %p1113_p12 = pnand %p1112_p11, %p1261_p5  ;;  %p1120_p2 = por %p1119_p1, %p1118_p0 }
  0x23   : > { %1044 = vmatmul.mubr.msk.f32.vlgmr.msra.gmra.mrb[2].mxu1 %vm472_vm3, %v469_v7  ;;  %p1114_p13 = pneg %p1113_p12 }
  0x24   : > { %742 = vmatpush1.msra.mxu1 %v736_v8  ;;  %805 = vmatprep.mubr.f32.mxu1 %v1175_v0 }
  0x25   : > { %p1121_p3 = pnand %p1120_p2, %p1114_p13 }
  0x27   : > { %1047 = vmatmul.mubr.msk.f32.vlgmr.msra.gmra.mrb[4].mxu1 %vm586_vm4, %v735_v9 }
  0xf2   : > { %v423_v10 = vpop.f32.mrb[0].mxu1 }
  0xf3   : > { %v425_v11 = vpop.f32.mrb[1].mxu1 }
  0xf4   : > { %v428_v12 = vadd.f32 %v425_v11, %v423_v10 }
  0xf6   : > { %v549_v13 = vpop.f32.mrb[2].mxu1 }
  0xf7   : > { %v551_v14 = vpop.f32.mrb[3].mxu1 }
  0xf8   : > { %v554_v15 = vadd.f32 %v551_v14, %v549_v13 }
  0xfa   : > { %v807_v16 = vpop.f32.mrb[4].mxu1  ;;  %555 = vadd.xlane.f32.xlu0 %v554_v15 }
  0xfb   : > { %v809_v17 = vpop.f32.mrb[5].mxu1 }
  0xfc   : > { %v812_v18 = vadd.f32 %v809_v17, %v807_v16 }
  0xfe   : > { %813 = vadd.xlane.f32.xlu1 %v812_v18  ;;  %429 = vadd.xlane.f32.xlu0 %v428_v12 }
 0x187   : > { %v556_v19 = vpop.xlane.xlu0 %555 }
 0x188   : > { %v557_v20 = vmul.f32 0.00390625, %v556_v19 }
 0x18a   : > { %v558_v21 = vsub.f32 %v549_v13, %v557_v20  ;;  %v559_v22 = vsub.f32 %v551_v14, %v557_v20 }
 0x18b   : > { %v814_v23 = vpop.xlane.xlu1 %813  ;;  %v430_v24 = vpop.xlane.xlu0 %429 }
 0x18c   : > { %v815_v25 = vmul.f32 0.00390625, %v814_v23  ;;  %v431_v26 = vmul.f32 0.00390625, %v430_v24  ;;  %v569_v27 = vmul.f32 0.2, %v559_v22  ;;  %v560_v28 = vmul.f32 %v558_v21, %v558_v21 }
 0x18d   : > { %v561_v29 = vmul.f32 %v559_v22, %v559_v22  ;;  %v568_v30 = vmul.f32 0.2, %v558_v21 }
 0x18e   : > { %v1296_v31 = vsub.f32 %v807_v16, %v815_v25  ;;  %v817_v32 = vsub.f32 %v809_v17, %v815_v25  ;;  %v432_v33 = vsub.f32 %v423_v10, %v431_v26  ;;  %v433_v34 = vsub.f32 %v425_v11, %v431_v26 }
 0x18f   : > { %v571_v35 = vmax.f32 %v559_v22, %v569_v27  ;;  %v562_v36 = vadd.f32 %v561_v29, %v560_v28  ;;  %v570_v37 = vmax.f32 %v558_v21, %v568_v30 }
 0x190   : > { %v818_v38 = vmul.f32 %v1296_v31, %v1296_v31  ;;  %v819_v39 = vmul.f32 %v817_v32, %v817_v32  ;;  %v443_v40 = vmul.f32 0.2, %v433_v34  ;;  %v434_v41 = vmul.f32 %v432_v33, %v432_v33 }
 0x191   : > { %590 = vmatprep.subr.mxu0 %v571_v35  ;;  %563 = vadd.xlane.f32.xlu1 %v562_v36  ;;  %v435_v42 = vmul.f32 %v433_v34, %v433_v34  ;;  %v442_v63 = vmul.f32 0.2, %v432_v33  ;;  %v827_v3 = vmul.f32 0.2, %v817_v32  ;;  %v826_v11 = vmul.f32 0.2, %v1296_v31 }
 0x192   : > { %591 = vmatpush1.msra.mxu0 %v570_v37  ;;  %v820_v43 = vadd.f32 %v819_v39, %v818_v38  ;;  %v445_v44 = vmax.f32 %v433_v34, %v443_v40 }
 0x193   : > { %v436_v45 = vadd.f32 %v435_v42, %v434_v41  ;;  %v444_v6 = vmax.f32 %v432_v33, %v442_v63  ;;  %v829_v8 = vmax.f32 %v817_v32, %v827_v3  ;;  %v828_v14 = vmax.f32 %v1296_v31, %v826_v11 }
 0x194   : > { %664 = vmatprep.subr.mxu0 %v445_v44 }
 0x195   : > { %821 = vadd.xlane.f32.xlu1 %v820_v43  ;;  %437 = vadd.xlane.f32.xlu0 %v436_v45 }
 0x1ab   : > { %923 = vperm.xlu0 %1103, %v920_v46  }
 0x21e   : > { %v564_v48 = vpop.xlane.xlu1 %563 }
 0x21f   : > { %v565_v49 = vmul.f32 0.00390625, %v564_v48 }
 0x221   : > { %v566_v50 = vadd.f32 1e-05, %v565_v49 }
 0x222   : > { %v822_v51 = vpop.xlane.xlu1 %821  ;;  %v438_v52 = vpop.xlane.xlu0 %437 }
 0x223   : > { %1105 = vrsqrt.f32 %v566_v50  ;;  %v439_v54 = vmul.f32 0.00390625, %v438_v52  ;;  %v823_v55 = vmul.f32 0.00390625, %v822_v51 }
 0x225   : > { %v440_v56 = vadd.f32 1e-05, %v439_v54  ;;  %v824_v59 = vadd.f32 1e-05, %v823_v55 }
 0x227   : > { %1107 = vrsqrt.f32 %v440_v56 }
 0x228   : > { %1109 = vrsqrt.f32 %v824_v59 }
 0x22a   : > { %v924_v17 = vpop.permute.xlu0 %923 }
 0x22d   : > { %v1106_v61 = vpop.eup %1105 }
 0x22e   : > { %v572_v62 = vmul.f32 0.33333334, %v1106_v61 }
 0x230   : > { %v577_v2 = vrot.slane %v572_v62, %v453_v60 }
 0x231   : > { %v1108_v4 = vpop.eup %1107 }
 0x232   : > { %v585_v5 = vmul.f32 %v577_v2, %v447_v1  ;;  %v446_v7 = vmul.f32 0.16666667, %v1108_v4  ;;  %v1110_v10 = vpop.eup %1109 }
 0x233   : > { %v830_v12 = vmul.f32 0.5, %v1110_v10 }
 0x234   : > { %1045 = vmatmul.mubr.msk.f32.vlgmr.msra.gmra.mrb[0].mxu0 %vm586_vm4, %v585_v5  ;;  %v454_v9 = vrot.slane %v446_v7, %v453_v60 }
 0x235   : > { %665 = vmatpush1.msra.mxu0 %v444_v6  ;;  %728 = vmatprep.mubr.f32.mxu0 %v1175_v0  ;;  %v835_v15 = vrot.slane %v830_v12, %v453_v60 }
 0x236   : > { %847 = vmatprep.subr.mxu0 %v829_v8  ;;  %v468_v13 = vmul.f32 %v454_v9, %v447_v1 }
 0x237   : > { %v843_v16 = vmul.f32 %v835_v15, %v447_v1 }
 0x23c   : > { %1046 = vmatmul.mubr.msk.f32.vlgmr.msra.gmra.mrb[0].mxu0 %vm586_vm4, %v468_v13 }
 0x23d   : > { %848 = vmatpush1.msra.mxu0 %v828_v14  ;;  %911 = vmatprep.mubr.f32.mxu0 %v1175_v0 }
 0x244   : > { %1048 = vmatmul.mubr.msk.f32.vlgmr.msra.gmra.mrb[0].mxu0 %vm586_vm4, %v843_v16 }
 0x317   : > { %v913_v18 = vpop.f32.mrb[0].mxu0 }
 0x318   : > { %v926_v19 = vadd.f32 %v924_v17, %v913_v18  ;;  %v915_v20 = vpop.f32.mrb[1].mxu0 }
 0x319   : > { %v927_v21 = vadd.f32 %v924_v17, %v915_v20 }
 0x31a   : > { %928 = vst [vmem:[%s328_s10] sm:$0xff] %v926_v19 }
 0x31b   : > { %929 = vst [vmem:[%s328_s10 + $0x8] sm:$0xff] %v927_v21 }
 0x31c   : > { %1124 = shalt.err (!%p1121_p3)
}
 0x31d   : > { %s1125_s22 = scalar_lea.hbm %s1318_s18, 256  ;;  %s1129_s25 = scalar_lea.hbm %s1368_s8, 512 }
 0x31e   : > { %p1126_p4 = scmp.ne.s32.totalorder %s1318_s18, %s1125_s22  ;;  %p1130_p9 = scmp.lt.u32.totalorder %s1318_s18, %s1368_s8 }
 0x31f   : > { %p1131_p10 = scmp.lt.u32.totalorder %s1129_s25, %s1125_s22  ;;  %p1133_p12 = scmp.lt.u32.totalorder %s1125_s22, %s1318_s18 }
 0x320   : > { %p1127_p7 = pnand %p1126_p4, %p1261_p5 }
 0x321   : > { %p1132_p11 = por %p1131_p10, %p1130_p9 }
 0x322   : > { %p1128_p8 = pneg %p1127_p7 }
 0x323   : > { %p1134_p13 = por %p1133_p12, %p1132_p11 }
 0x325   : > { %p1135_p0 = pnand %p1134_p13, %p1128_p8 }
 0x327   : > { %1138 = shalt.err (!%p1135_p0)
}
 0x328   : > { %1062 = dma.vmem_to_hbm [thread:$0]  (%p1261_p5), %s1320_s12, 256, %s1318_s18, %s931_s14  }
 0x329 PF: > { %p1068_p1 = scmp.ge.s32.totalorder %s1173_s30, 2  ;;  %s957_s13 = sand.u32 1, %s1161_s27  }
 0x32a   : > { %s958_s17 = scalar_lea.sflag [#allocation3], %s957_s13 }
 0x32b   : > { %p1065_p2 = pnand %p1068_p1, %p1265_p6 }
 0x32d   : > { %1156 = dma.done.wait (!%p1065_p2), %s958_s17, 256  }
 0x32e   : > { %1158 = vsyncadd (!%p1065_p2), %s958_s17, 4294967040  ;;  %s1372_s9 = sld [smem:[#allocation5_spill]]  ;;  %p18_p3 = scmp.ge.s32.totalorder %s1248_s11, 4  }
 0x32f   : > { %s1373_s27 = smov %s1165_s28  ;;  %s1374_s28 = smov %s1169_s29 }
 0x330   : > { %s1376_s30 = smov %s1248_s11  ;;  %20 = sbr.rel (!%p18_p3) target bundleno = 3 (0x3), region = 93 }
 0x334   : > { %s1375_s29 = smov %s1372_s9 }
 0x337   :  { %963 = vsyncpa [#allocation3], 1 }
 0x338   :  { %965 = vsyncpa [#allocation3 + $0x1], 1 }

</bundles_post_ra>
